<compile_context>
chip_gen: v7x
topology: tpu7x:2x2x1
jax: 0.10.0
libtpu: 0.0.40
codegen_flags: <defaults>
</compile_context>

<pallas_src>
import functools

import jax
import jax.numpy as jnp
from jax import lax
from jax.experimental import pallas as pl
from jax.experimental.pallas import tpu as pltpu


# ----------------------------- Pallas kernels -----------------------------

def patch_embed_kernel(x_ref, o_ref):
    # x_ref: (1, C, tL)   o_ref: (1, tL, C)
    o_ref[0] = x_ref[0].T.astype(o_ref.dtype)


def patch_embed_ln_kernel(x_ref, g_ref, b_ref, o_ref, *, eps):
    # x_ref: (1, C, tL), g_ref/b_ref: (1, C), o_ref: (1, tL, C)
    xt = x_ref[0].T.astype(jnp.float32)                      # (tL, C)
    mu = jnp.mean(xt, axis=-1, keepdims=True)
    xc = xt - mu
    var = jnp.mean(xc * xc, axis=-1, keepdims=True)
    xn = xc * lax.rsqrt(var + eps)
    y = xn * g_ref[...] + b_ref[...]                         # broadcast (1, C)
    o_ref[0] = y.astype(o_ref.dtype)


# ----------------------------- pallas_call wrapper -----------------------------

def _pick_tile_l(L, max_tile=2048):
    # Largest multiple of 128 dividing L (lane-dense input loads, (8,128)-legal
    # output sublane tiles); fall back to the full extent, which is always legal.
    for t in (2048, 1024, 512, 256, 128):
        if t <= max_tile and L % t == 0:
            return t
    return L


def patch_embed_forward(x_nchw, gamma=None, beta=None, eps=1e-5):
    """PatchEmbed.forward: (B, C, H, W) -> (B, H*W, C), optional fused LayerNorm(C)."""
    B, C, H, W = x_nchw.shape
    L = H * W
    x = x_nchw.reshape(B, C, L)        # free: flattening contiguous trailing dims
    tL = _pick_tile_l(L)
    grid = (B, L // tL)

    in_specs = [pl.BlockSpec((1, C, tL), lambda b, l: (b, 0, l))]
    out_spec = pl.BlockSpec((1, tL, C), lambda b, l: (b, l, 0))
    out_shape = jax.ShapeDtypeStruct((B, L, C), x.dtype)
    cp = pltpu.CompilerParams(dimension_semantics=("parallel", "parallel"))

    if gamma is None:                                        # norm_layer=None (default)
        return pl.pallas_call(
            patch_embed_kernel,
            out_shape=out_shape,
            grid=grid,
            in_specs=in_specs,
            out_specs=out_spec,
            compiler_params=cp,
        )(x)

    # norm_layer=nn.LayerNorm(embed_dim): fused into the same single pass.
    in_specs = in_specs + [
        pl.BlockSpec((1, C), lambda b, l: (0, 0)),
        pl.BlockSpec((1, C), lambda b, l: (0, 0)),
    ]
    return pl.pallas_call(
        functools.partial(patch_embed_ln_kernel, eps=eps),
        out_shape=out_shape,
        grid=grid,
        in_specs=in_specs,
        out_specs=out_spec,
        compiler_params=cp,
    )(x, gamma.reshape(1, C), beta.reshape(1, C))


# ----------------------------- pure-JAX reference -----------------------------

def reference_forward(x_nchw, gamma=None, beta=None, eps=1e-5):
    B, C, H, W = x_nchw.shape
    y = jnp.transpose(x_nchw.reshape(B, C, H * W), (0, 2, 1))   # (B, L, C)
    if gamma is not None:
        mu = jnp.mean(y, axis=-1, keepdims=True)
        var = jnp.mean((y - mu) ** 2, axis=-1, keepdims=True)
        y = (y - mu) / jnp.sqrt(var + eps) * gamma + beta
    return y


if __name__ == "__main__":
    key = jax.random.PRNGKey(0)
    B, C, H, W = 2, 96, 16, 16          # embed_dim=96 (module default), small spatial
    k1, k2, k3 = jax.random.split(key, 3)
    x = jax.random.normal(k1, (B, C, H, W), jnp.float32)

    # Default module config: norm_layer=None -> pure flatten(2) + transpose(1, 2).
    out = jax.block_until_ready(patch_embed_forward(x))
    ref = reference_forward(x)
    assert out.shape == (B, H * W, C), out.shape
    assert jnp.allclose(out, ref, atol=1e-6, rtol=1e-6), \
        float(jnp.max(jnp.abs(out - ref)))

    # Optional norm_layer=nn.LayerNorm(embed_dim) path (fused in the same kernel pass).
    gamma = 1.0 + 0.1 * jax.random.normal(k2, (C,), jnp.float32)
    beta = 0.1 * jax.random.normal(k3, (C,), jnp.float32)
    out_ln = jax.block_until_ready(patch_embed_forward(x, gamma, beta))
    ref_ln = reference_forward(x, gamma, beta)
    assert out_ln.shape == (B, H * W, C), out_ln.shape
    assert jnp.allclose(out_ln, ref_ln, atol=1e-4, rtol=1e-4), \
        float(jnp.max(jnp.abs(out_ln - ref_ln)))

    print("KERNEL_OK")
</pallas_src>

<mosaic_0001>
module attributes {stable_mosaic.version = 11 : i64} {
  func.func @patch_embed_kernel(%arg0: i32, %arg1: i32, %arg2: memref<1x96x256xf32, #tpu.memory_space<vmem>>, %arg3: memref<1x256x96xf32, #tpu.memory_space<vmem>>) attributes {dimension_semantics = [#tpu.dimension_semantics<parallel>, #tpu.dimension_semantics<parallel>], iteration_bounds = array<i64: 2, 1>, scalar_prefetch = 0 : i64, scratch_operands = 0 : i64, tpu.core_type = #tpu.core_type<tc>, window_params = [{transform_indices = @transform_0, window_bounds = array<i64: 1, 96, 256>}, {transform_indices = @transform_1, window_bounds = array<i64: 1, 256, 96>}]} {
    %c0 = arith.constant 0 : index
    %c0_0 = arith.constant 0 : index
    %c0_1 = arith.constant 0 : index
    %0 = vector.load %arg2[%c0, %c0_0, %c0_1] : memref<1x96x256xf32, #tpu.memory_space<vmem>>, vector<1x96x256xf32>
    %1 = vector.shape_cast %0 : vector<1x96x256xf32> to vector<96x256xf32>
    %2 = tpu.transpose %1, [1, 0] : vector<96x256xf32> -> vector<256x96xf32>
    %c0_2 = arith.constant 0 : index
    %c0_3 = arith.constant 0 : index
    %c0_4 = arith.constant 0 : index
    %3 = vector.load %arg3[%c0_2, %c0_3, %c0_4] : memref<1x256x96xf32, #tpu.memory_space<vmem>>, vector<1x256x96xf32>
    %4 = vector.shape_cast %3 : vector<1x256x96xf32> to vector<256x96xf32>
    %5 = vector.shape_cast %2 : vector<256x96xf32> to vector<1x256x96xf32>
    tpu.vector_store %arg3[%c0_2, %c0_3, %c0_4], %5 {strides = array<i32>} : memref<1x256x96xf32, #tpu.memory_space<vmem>>, vector<1x256x96xf32>,
    return
  }
  func.func @transform_0(%arg0: i32, %arg1: i32) -> (i32, i32, i32) {
    %c0_i32 = arith.constant 0 : i32
    %c0_i32_0 = arith.constant 0 : i32
    return %arg0, %c0_i32, %arg1 : i32, i32, i32
  }
  func.func @transform_1(%arg0: i32, %arg1: i32) -> (i32, i32, i32) {
    %c0_i32 = arith.constant 0 : i32
    %c0_i32_0 = arith.constant 0 : i32
    return %arg0, %arg1, %c0_i32 : i32, i32, i32
  }
}

</mosaic_0001>

<bundles_post_ra>
// kernel: tpu_custom_call.1
= control target key start
LH: loop header
LB: loop body
LE: loop exit
PB: predicated region body
PF: predicated region fallthrough
CT: control target
= control target key end

     0   :  { %6 = vsyncpa [#allocation3], 0  ;;  %s758_s0 = inlined_call_operand.hbm [shape: f32[2,96,256], index: 0, kind: input, shape index: {}]   ;;  %s759_s1 = inlined_call_operand.vmem [shape: f32[2,256,96], index: 1, kind: output, shape index: {}]  }
   0x1   :  { %8 = vsyncpa [#allocation3 + $0x1], 0  ;;  %s548_s6 = smov 0   ;;  %s550_s7 = smov 0  }
   0x2   :  { %s552_s8 = smov 0   ;;  %s554_s9 = smov 0  }
   0x3   :  { %s556_s10 = smov 0   ;;  %s558_s11 = smov 0  }
   0x4 LB: > { %s381_s12 = sadd.s32 4294967295, %s533_s11   ;;  %s26_s13 = sadd.s32 1, %s529_s10  ;;  %s533_s11 = sphi %s558_s11, %s14_s11   ;;  %s529_s10 = sphi %s556_s10, %s766_s10   ;;  %s525_s9 = sphi %s554_s9, %s765_s9   ;;  %s521_s8 = sphi %s552_s8, %s764_s8   ;;  %s517_s7 = sphi %s550_s7, %s763_s7   ;;  %s513_s6 = sphi %s548_s6, %s762_s6  }
   0x5   : > { %p28_p0 = scmp.ge.s32.totalorder %s26_s13, 2  ;;  %s35_s14 = sadd.s32 1, %s521_s8 }
   0x6   : > { %p42_p1 = scmp.ne.s32.totalorder %s521_s8, %s517_s7  ;;  %p43_p2 = scmp.eq.s32.totalorder %s533_s11, 0 }
   0x7   : > { %s768_s13 = smov (%p28_p0, %s26_s13), 0  ;;  %p48_p4 = scmp.ne.s32.totalorder %s517_s7, %s513_s6 }
   0x8   : > { %p44_p3 = por %p43_p2, %p42_p1  ;;  %s30_s15 = ssub.s32 %s529_s10, %s768_s13 }
   0x9   : > { %p49_p5 = scmp.eq.s32.totalorder %s381_s12, 0  ;;  %p33_p6 = scmp.eq.s32.totalorder %s30_s15, 0 }
   0xa   : > { %p401_p8 = scmp.lt.s32.totalorder %s533_s11, 2  ;;  %s100_s18 = sand.u32 1, %s521_s8  }
   0xb   : > { %p587_p7 = por %p49_p5, %p48_p4  ;;  %s393_s19 = smul.u32 3072, %s529_s10 }
   0xc   : > { %s593_s17 = scalar_select %p33_p6, %s521_s8, %s35_s14  }
   0xd   : > { %s392_s20 = smul.u32 192, %s100_s18  ;;  %s600_s23 = scalar_lea.hbm %s758_s0, %s393_s19 }
   0xe   : > { %p602_p9 = pnand %p401_p8, %p44_p3  ;;  %s608_s27 = scalar_lea.sflag [#allocation3], %s100_s18 }
   0xf   : > { %s104_s25 = scalar_lea.vmem [#allocation2], %s392_s20  ;;  %s453_s28 = scalar_lea.hbm %s600_s23, 3072 }
  0x10   : > { %s113_s26 = sshll.u32 %s104_s25, 4  ;;  %p454_p10 = scmp.ne.s32.totalorder %s600_s23, %s453_s28  ;;  %s606_s26 = int_to_ptr.vmem [resolvable:$true] %s113_s26 }
  0x11   : > { %p455_p11 = pneg %p602_p9  ;;  %s458_s2 = scalar_lea.hbm %s758_s0, 6144 }
  0x12   : > { %p459_p0 = scmp.lt.u32.totalorder %s600_s23, %s758_s0  ;;  %p460_p1 = scmp.lt.u32.totalorder %s458_s2, %s453_s28 }
  0x13   : > { %p456_p12 = pnand %p455_p11, %p454_p10  ;;  %p462_p3 = scmp.lt.u32.totalorder %s453_s28, %s600_s23 }
  0x14   : > { %p461_p2 = por %p460_p1, %p459_p0 }
  0x15   : > { %p457_p13 = pneg %p456_p12 }
  0x16   : > { %p463_p4 = por %p462_p3, %p461_p2 }
  0x18   : > { %p464_p5 = pnand %p463_p4, %p457_p13 }
  0x1a   : > { %467 = shalt.err (!%p464_p5)
}
  0x1b   : > { %s468_s5 = scalar_lea.vmem %s606_s26, 3072  ;;  %s535_s6 = smov [#allocation2]  }
  0x1c   : > { %p469_p6 = scmp.ne.s32.totalorder %s606_s26, %s468_s5  ;;  %s473_s12 = sshll.u32 %s535_s6, 4  ;;  %s474_s12 = int_to_ptr.vmem [resolvable:$false] %s473_s12 }
  0x1d   : > { %s475_s14 = scalar_lea.vmem %s474_s12, 6144  ;;  %p476_p12 = scmp.lt.s32.totalorder %s606_s26, %s474_s12 }
  0x1e   : > { %p471_p8 = pnand %p469_p6, %p455_p11  ;;  %p477_p0 = scmp.lt.s32.totalorder %s475_s14, %s468_s5 }
  0x20   : > { %p472_p10 = pneg %p471_p8  ;;  %p478_p1 = por %p477_p0, %p476_p12 }
  0x22   : > { %p479_p2 = pnand %p478_p1, %p472_p10 }
  0x24   : > { %482 = shalt.err (!%p479_p2)
}
  0x25   : > { %s536_s15 = smov 256   ;;  %s537_s18 = smov 16  }
  0x26   : > { %400 = dma.hbm_to_vmem [thread:$0]  (!%p602_p9), %s600_s23, 3072, %s606_s26, %s608_s27, %s536_s15, %s536_s15, %s537_s18  }
  0x27   : > { %p386_p11 = scmp.ge.s32.totalorder %s533_s11, 1  ;;  %p121_p13 = scmp.lt.s32.totalorder %s533_s11, 3 }
  0x29   : > { %p122_p3 = pnand %p386_p11, %p121_p13 }
  0x2a   : > { %s127_s19 = sand.u32 (!%p122_p3), 1, %s517_s7  }
  0x2b   : > { %125 = sbr.rel (%p122_p3) target bundleno = 242 (0xf2), region = 24  ;;  %s128_s21 = scalar_lea.sflag (!%p122_p3), [#allocation3], %s127_s19 }
  0x2c   : > { %s394_s20 = smul.u32 (!%p122_p3), 192, %s127_s19 }
  0x2e   : > { %s639_s22 = scalar_lea.vmem (!%p122_p3), [#allocation2], %s394_s20 }
  0x32   : > { %508 = dma.done.wait (%p587_p7), %s128_s21, 3072  }
  0x33   : > { %510 = vsyncadd (%p587_p7), %s128_s21, 4294964224  ;;  %v166_v0 = vld [vmem:[%s639_s22 + $0x8] sm:$0xff]  ;;  %v165_v1 = vld [vmem:[%s639_s22] sm:$0xff]  ;;  %p156_p7 = scmp.lt.s32.totalorder %s525_s9, 1  ;;  %vm253_vm0 = vcmask 785408  }
  0x34   : > { %221 = vxpose.xlu1.b32.start [1/12] (short) %v166_v0, 128  ;;  %189 = vxpose.xlu0.b32.start [1/12] (short) %v165_v1, 128  ;;  %v168_v2 = vld [vmem:[%s639_s22 + $0x18] sm:$0xff]  ;;  %v167_v3 = vld [vmem:[%s639_s22 + $0x10] sm:$0xff]  ;;  %v170_v4 = vld [vmem:[%s639_s22 + $0x28] sm:$0xff] }
  0x35   : > { %v169_v5 = vld [vmem:[%s639_s22 + $0x20] sm:$0xff]  ;;  %v172_v6 = vld [vmem:[%s639_s22 + $0x38] sm:$0xff]  ;;  %v171_v7 = vld [vmem:[%s639_s22 + $0x30] sm:$0xff]  ;;  %s770_s9 = smov (!%p156_p7, %s525_s9), 1 }
  0x36   : > { %v174_v8 = vld [vmem:[%s639_s22 + $0x48] sm:$0xff]  ;;  %v173_v9 = vld [vmem:[%s639_s22 + $0x40] sm:$0xff]  ;;  %v176_v10 = vld [vmem:[%s639_s22 + $0x58] sm:$0xff]  ;;  %s391_s16 = sshll.u32 %s770_s9, 8 }
  0x37   : > { %v175_v11 = vld [vmem:[%s639_s22 + $0x50] sm:$0xff]  ;;  %v178_v12 = vld [vmem:[%s639_s22 + $0x68] sm:$0xff]  ;;  %v177_v13 = vld [vmem:[%s639_s22 + $0x60] sm:$0xff]  ;;  %s674_s25 = scalar_lea.vmem %s759_s1, %s391_s16 }
  0x38   : > { %222 = vxpose.xlu1.b32.cont [2/12] (short) %v168_v2, 128  ;;  %190 = vxpose.xlu0.b32.cont [2/12] (short) %v167_v3, 128  ;;  %v180_v14 = vld [vmem:[%s639_s22 + $0x78] sm:$0xff]  ;;  %v179_v15 = vld [vmem:[%s639_s22 + $0x70] sm:$0xff]  ;;  %v182_v16 = vld [vmem:[%s639_s22 + $0x88] sm:$0xff] }
  0x39   : > { %v181_v17 = vld [vmem:[%s639_s22 + $0x80] sm:$0xff]  ;;  %v184_v18 = vld [vmem:[%s639_s22 + $0x98] sm:$0xff]  ;;  %v183_v19 = vld [vmem:[%s639_s22 + $0x90] sm:$0xff] }
  0x3a   : > { %v186_v20 = vld [vmem:[%s639_s22 + $0xa8] sm:$0xff]  ;;  %v185_v21 = vld [vmem:[%s639_s22 + $0xa0] sm:$0xff]  ;;  %v188_v22 = vld [vmem:[%s639_s22 + $0xb8] sm:$0xff] }
  0x3b   : > { %v187_v23 = vld [vmem:[%s639_s22 + $0xb0] sm:$0xff] }
  0x3c   : > { %223 = vxpose.xlu1.b32.cont [3/12] (short) %v170_v4, 128  ;;  %191 = vxpose.xlu0.b32.cont [3/12] (short) %v169_v5, 128 }
  0x40   : > { %224 = vxpose.xlu1.b32.cont [4/12] (short) %v172_v6, 128  ;;  %192 = vxpose.xlu0.b32.cont [4/12] (short) %v171_v7, 128 }
  0x44   : > { %225 = vxpose.xlu1.b32.cont [5/12] (short) %v174_v8, 128  ;;  %193 = vxpose.xlu0.b32.cont [5/12] (short) %v173_v9, 128 }
  0x48   : > { %226 = vxpose.xlu1.b32.cont [6/12] (short) %v176_v10, 128  ;;  %194 = vxpose.xlu0.b32.cont [6/12] (short) %v175_v11, 128 }
  0x4c   : > { %227 = vxpose.xlu1.b32.cont [7/12] (short) %v178_v12, 128  ;;  %195 = vxpose.xlu0.b32.cont [7/12] (short) %v177_v13, 128 }
  0x50   : > { %228 = vxpose.xlu1.b32.cont [8/12] (short) %v180_v14, 128  ;;  %196 = vxpose.xlu0.b32.cont [8/12] (short) %v179_v15, 128 }
  0x54   : > { %229 = vxpose.xlu1.b32.cont [9/12] (short) %v182_v16, 128  ;;  %197 = vxpose.xlu0.b32.cont [9/12] (short) %v181_v17, 128 }
  0x58   : > { %230 = vxpose.xlu1.b32.cont [10/12] (short) %v184_v18, 128  ;;  %198 = vxpose.xlu0.b32.cont [10/12] (short) %v183_v19, 128 }
  0x5c   : > { %231 = vxpose.xlu1.b32.cont [11/12] (short) %v186_v20, 128  ;;  %199 = vxpose.xlu0.b32.cont [11/12] (short) %v185_v21, 128 }
  0x60   : > { %232 = vxpose.xlu1.b32.end [12/12] (short) %v188_v22, 128  ;;  %200 = vxpose.xlu0.b32.end [12/12] (short) %v187_v23, 128 }
  0xb4   : > { %v237_v24 = vpop.trf.xlu1  ;;  %v205_v25 = vpop.trf.xlu0 }
  0xb5   : > { %270 = vst.msk [vmem:[%s674_s25 + $0x80] sm:$0xff] %vm253_vm0, %v237_v24  ;;  %254 = vst.msk [vmem:[%s674_s25] sm:$0xff] %vm253_vm0, %v205_v25 }
  0xb8   : > { %v238_v26 = vpop.trf.xlu1  ;;  %v206_v27 = vpop.trf.xlu0 }
  0xb9   : > { %271 = vst.msk [vmem:[%s674_s25 + $0x88] sm:$0xff] %vm253_vm0, %v238_v26  ;;  %255 = vst.msk [vmem:[%s674_s25 + $0x8] sm:$0xff] %vm253_vm0, %v206_v27 }
  0xbc   : > { %v239_v28 = vpop.trf.xlu1  ;;  %v207_v29 = vpop.trf.xlu0 }
  0xbd   : > { %272 = vst.msk [vmem:[%s674_s25 + $0x90] sm:$0xff] %vm253_vm0, %v239_v28  ;;  %256 = vst.msk [vmem:[%s674_s25 + $0x10] sm:$0xff] %vm253_vm0, %v207_v29 }
  0xc0   : > { %v240_v30 = vpop.trf.xlu1  ;;  %v208_v31 = vpop.trf.xlu0 }
  0xc1   : > { %273 = vst.msk [vmem:[%s674_s25 + $0x98] sm:$0xff] %vm253_vm0, %v240_v30  ;;  %257 = vst.msk [vmem:[%s674_s25 + $0x18] sm:$0xff] %vm253_vm0, %v208_v31 }
  0xc4   : > { %v241_v32 = vpop.trf.xlu1  ;;  %v209_v33 = vpop.trf.xlu0 }
  0xc5   : > { %274 = vst.msk [vmem:[%s674_s25 + $0xa0] sm:$0xff] %vm253_vm0, %v241_v32  ;;  %258 = vst.msk [vmem:[%s674_s25 + $0x20] sm:$0xff] %vm253_vm0, %v209_v33 }
  0xc8   : > { %v242_v34 = vpop.trf.xlu1  ;;  %v210_v35 = vpop.trf.xlu0 }
  0xc9   : > { %275 = vst.msk [vmem:[%s674_s25 + $0xa8] sm:$0xff] %vm253_vm0, %v242_v34  ;;  %259 = vst.msk [vmem:[%s674_s25 + $0x28] sm:$0xff] %vm253_vm0, %v210_v35 }
  0xcc   : > { %v243_v36 = vpop.trf.xlu1  ;;  %v211_v37 = vpop.trf.xlu0 }
  0xcd   : > { %276 = vst.msk [vmem:[%s674_s25 + $0xb0] sm:$0xff] %vm253_vm0, %v243_v36  ;;  %260 = vst.msk [vmem:[%s674_s25 + $0x30] sm:$0xff] %vm253_vm0, %v211_v37 }
  0xd0   : > { %v244_v38 = vpop.trf.xlu1  ;;  %v212_v39 = vpop.trf.xlu0 }
  0xd1   : > { %277 = vst.msk [vmem:[%s674_s25 + $0xb8] sm:$0xff] %vm253_vm0, %v244_v38  ;;  %261 = vst.msk [vmem:[%s674_s25 + $0x38] sm:$0xff] %vm253_vm0, %v212_v39 }
  0xd4   : > { %v245_v40 = vpop.trf.xlu1  ;;  %v213_v41 = vpop.trf.xlu0 }
  0xd5   : > { %278 = vst.msk [vmem:[%s674_s25 + $0xc0] sm:$0xff] %vm253_vm0, %v245_v40  ;;  %262 = vst.msk [vmem:[%s674_s25 + $0x40] sm:$0xff] %vm253_vm0, %v213_v41 }
  0xd8   : > { %v246_v42 = vpop.trf.xlu1  ;;  %v214_v43 = vpop.trf.xlu0 }
  0xd9   : > { %279 = vst.msk [vmem:[%s674_s25 + $0xc8] sm:$0xff] %vm253_vm0, %v246_v42  ;;  %263 = vst.msk [vmem:[%s674_s25 + $0x48] sm:$0xff] %vm253_vm0, %v214_v43 }
  0xdc   : > { %v247_v44 = vpop.trf.xlu1  ;;  %v215_v45 = vpop.trf.xlu0 }
  0xdd   : > { %280 = vst.msk [vmem:[%s674_s25 + $0xd0] sm:$0xff] %vm253_vm0, %v247_v44  ;;  %264 = vst.msk [vmem:[%s674_s25 + $0x50] sm:$0xff] %vm253_vm0, %v215_v45 }
  0xe0   : > { %v248_v46 = vpop.trf.xlu1  ;;  %v216_v47 = vpop.trf.xlu0 }
  0xe1   : > { %281 = vst.msk [vmem:[%s674_s25 + $0xd8] sm:$0xff] %vm253_vm0, %v248_v46  ;;  %265 = vst.msk [vmem:[%s674_s25 + $0x58] sm:$0xff] %vm253_vm0, %v216_v47 }
  0xe4   : > { %v249_v48 = vpop.trf.xlu1  ;;  %v217_v49 = vpop.trf.xlu0 }
  0xe5   : > { %282 = vst.msk [vmem:[%s674_s25 + $0xe0] sm:$0xff] %vm253_vm0, %v249_v48  ;;  %266 = vst.msk [vmem:[%s674_s25 + $0x60] sm:$0xff] %vm253_vm0, %v217_v49 }
  0xe8   : > { %v250_v50 = vpop.trf.xlu1  ;;  %v218_v51 = vpop.trf.xlu0 }
  0xe9   : > { %283 = vst.msk [vmem:[%s674_s25 + $0xe8] sm:$0xff] %vm253_vm0, %v250_v50  ;;  %267 = vst.msk [vmem:[%s674_s25 + $0x68] sm:$0xff] %vm253_vm0, %v218_v51 }
  0xec   : > { %v251_v52 = vpop.trf.xlu1  ;;  %v219_v53 = vpop.trf.xlu0 }
  0xed   : > { %284 = vst.msk [vmem:[%s674_s25 + $0xf0] sm:$0xff] %vm253_vm0, %v251_v52  ;;  %268 = vst.msk [vmem:[%s674_s25 + $0x70] sm:$0xff] %vm253_vm0, %v219_v53 }
  0xf0   : > { %v252_v54 = vpop.trf.xlu1  ;;  %v220_v55 = vpop.trf.xlu0 }
  0xf1   : > { %285 = vst.msk [vmem:[%s674_s25 + $0xf8] sm:$0xff] %vm253_vm0, %v252_v54  ;;  %269 = vst.msk [vmem:[%s674_s25 + $0x78] sm:$0xff] %vm253_vm0, %v220_v55 }
  0xf2 PF: > { %s14_s11 = sadd.s32 1, %s533_s11   ;;  %s762_s6 = smov %s517_s7 }
  0xf3   : > { %p11_p9 = scmp.ge.s32.totalorder %s14_s11, 4   ;;  %s763_s7 = smov %s521_s8 }
  0xf4   : > { %s764_s8 = smov %s593_s17  ;;  %s765_s9 = smov %s529_s10 }
  0xf5   : > { %s766_s10 = smov %s768_s13  ;;  %13 = sbr.rel (!%p11_p9) target bundleno = 4 (0x4), region = 64 }
  0xfc   :  { %316 = vsyncpa [#allocation3], 1 }
  0xfd   :  { %318 = vsyncpa [#allocation3 + $0x1], 1 }

</bundles_post_ra>
